<compile_context>
chip_gen: v7x
topology: tpu7x:2x2x1
jax: 0.10.0
libtpu: 0.0.40
codegen_flags: <defaults>
</compile_context>

<pallas_src>
import functools

import jax
import jax.numpy as jnp
from jax.experimental import pallas as pl
from jax.experimental.pallas import tpu as pltpu


def conv_bn_relu_kernel(x_ref, w_ref, shift_ref, o_ref, *, KH, KW, Wp, LW):
    # x_ref:     (1, Cin, L)        flat zero-padded image (bf16),
    #                               L >= (KH-1)*Wp + (KW-1) + LW
    # w_ref:     (KH*KW, Cout, Cin) bf16 weights with BN scale pre-folded
    # shift_ref: (Cout, 1)          f32 folded conv-bias + BN shift
    # o_ref:     (1, Cout, LW)      bf16, LW = round_up(Ho*Wp, 128); columns
    #                               past Wo of each row (and past Ho*Wp) are
    #                               harmless wrap values trimmed by the wrapper.
    x = x_ref[0]                                          # (Cin, L) bf16

    # KH*KW accumulating MXU dots over statically shifted lane slices.
    # No im2col patch buffer, no sublane-misaligned concatenate; the f32
    # accumulator lives in vregs (Cout x LW is small per step).
    acc = None
    tap = 0
    for kh in range(KH):
        for kw in range(KW):
            off = kh * Wp + kw
            rhs = x[:, off:off + LW]                      # (Cin, LW) lane shift
            part = jnp.dot(w_ref[tap], rhs,
                           preferred_element_type=jnp.float32)   # (Cout, LW) f32
            acc = part if acc is None else acc + part
            tap += 1

    # Fused (bias + BN shift) + ReLU epilogue; bf16 cast, lane-dense store.
    y = jnp.maximum(acc + shift_ref[...], 0.0)
    o_ref[0, :, :] = y.astype(o_ref.dtype)


def conv_layer_forward(x_nchw, weight, bias, gamma, beta,
                       running_mean, running_var, *,
                       stride=1, padding=1, eps=1e-5):
    # TODO(synk): only stride=1, dilation=1, groups=1, symmetric padding are
    # supported; this matches the module configuration exercised here.
    assert stride == 1

    N, Cin, H, W = x_nchw.shape
    Cout, Cin_w, KH, KW = weight.shape
    assert Cin == Cin_w

    Hp, Wp = H + 2 * padding, W + 2 * padding
    Ho, Wo = Hp - KH + 1, Wp - KW + 1

    # Round the flat output length up to 128 lanes -> unmasked lane-dense stores.
    LW = ((Ho * Wp + 127) // 128) * 128

    # Extra zero bottom rows so every shifted slice of length LW stays in bounds:
    # needed flat length = (KH-1)*Wp + (KW-1) + LW.
    needed = (KH - 1) * Wp + (KW - 1) + LW
    extra_rows = max(0, -(-(needed - Hp * Wp) // Wp))
    L = (Hp + extra_rows) * Wp

    # One fused pad + bf16-cast pass (stays NCHW); flatten H/W into lanes.
    # TODO(synk): for production sizes move the halo/pad into the kernel and
    # keep activations bf16 across the whole Sequential to drop this pass.
    x_pad = jnp.pad(x_nchw, ((0, 0), (0, 0),
                             (padding, padding + extra_rows),
                             (padding, padding)))
    x_flat = x_pad.reshape(N, Cin, L).astype(jnp.bfloat16)

    # Fold BN (running stats) into per-channel scale/shift, then fold the scale
    # into the weights.  Tap order (kh, kw), each tap a (Cout, Cin) matrix.
    inv_std = 1.0 / jnp.sqrt(running_var + eps)
    scale = (gamma * inv_std).astype(jnp.float32)                        # (Cout,)
    shift = (beta + (bias - running_mean) * gamma * inv_std)
    shift = shift.astype(jnp.float32).reshape(Cout, 1)
    w_scaled = weight.astype(jnp.float32) * scale[:, None, None, None]
    w_taps = jnp.transpose(w_scaled, (2, 3, 0, 1)).reshape(KH * KW, Cout, Cin)
    w_taps = w_taps.astype(jnp.bfloat16)

    kernel = functools.partial(conv_bn_relu_kernel, KH=KH, KW=KW, Wp=Wp, LW=LW)

    out = pl.pallas_call(
        kernel,
        out_shape=jax.ShapeDtypeStruct((N, Cout, LW), jnp.bfloat16),
        grid_spec=pltpu.PrefetchScalarGridSpec(
            num_scalar_prefetch=0,
            grid=(N,),
            in_specs=[
                pl.BlockSpec((1, Cin, L), lambda n: (n, 0, 0)),
                pl.BlockSpec((KH * KW, Cout, Cin), lambda n: (0, 0, 0)),  # resident
                pl.BlockSpec((Cout, 1), lambda n: (0, 0)),                # resident
            ],
            out_specs=pl.BlockSpec((1, Cout, LW), lambda n: (n, 0, 0)),
        ),
        compiler_params=pltpu.CompilerParams(
            dimension_semantics=("parallel",),        # batch elements independent
            vmem_limit_bytes=32 * 1024 * 1024),
    )(x_flat, w_taps, shift)

    # Trim the wrap columns (bf16, one small pass).  Result is already NCHW.
    # TODO(synk): in a longer Sequential chain the next layer should consume
    # the (Ho, Wp)-padded layout directly, making this trim disappear.
    out = out[:, :, :Ho * Wp].reshape(N, Cout, Ho, Wp)[:, :, :, :Wo]
    return out


def reference_forward(x_nchw, weight, bias, gamma, beta,
                      running_mean, running_var, *, stride=1, padding=1, eps=1e-5):
    y = jax.lax.conv_general_dilated(
        x_nchw, weight,
        window_strides=(stride, stride),
        padding=[(padding, padding), (padding, padding)],
        dimension_numbers=("NCHW", "OIHW", "NCHW"))
    y = y + bias[None, :, None, None]
    y = (y - running_mean[None, :, None, None]) / jnp.sqrt(
        running_var[None, :, None, None] + eps)
    y = y * gamma[None, :, None, None] + beta[None, :, None, None]
    return jnp.maximum(y, 0.0)


if __name__ == "__main__":
    key = jax.random.PRNGKey(0)
    N, Cin, H, W = 2, 4, 16, 16
    Cout, K = 8, 3

    k_x, k_w, k_b, k_g, k_be, k_m, k_v = jax.random.split(key, 7)
    x = jax.random.normal(k_x, (N, Cin, H, W), dtype=jnp.float32)
    weight = jax.random.normal(k_w, (Cout, Cin, K, K), dtype=jnp.float32) * 0.1
    bias = jax.random.normal(k_b, (Cout,), dtype=jnp.float32) * 0.1
    gamma = 1.0 + 0.1 * jax.random.normal(k_g, (Cout,), dtype=jnp.float32)
    beta = 0.1 * jax.random.normal(k_be, (Cout,), dtype=jnp.float32)
    running_mean = 0.1 * jax.random.normal(k_m, (Cout,), dtype=jnp.float32)
    running_var = jnp.abs(1.0 + 0.1 * jax.random.normal(k_v, (Cout,), dtype=jnp.float32))

    out = conv_layer_forward(x, weight, bias, gamma, beta,
                             running_mean, running_var,
                             stride=1, padding=1)
    out = jax.block_until_ready(out)

    ref = reference_forward(x, weight, bias, gamma, beta,
                            running_mean, running_var,
                            stride=1, padding=1)
    ref = jax.block_until_ready(ref)

    assert out.shape == (N, Cout, H, W), out.shape
    # bf16 activations/weights/output vs f32 reference -> relaxed tolerance.
    out_f32 = out.astype(jnp.float32)
    max_err = float(jnp.max(jnp.abs(out_f32 - ref)))
    assert jnp.allclose(out_f32, ref, atol=5e-2, rtol=5e-2), max_err
    print("KERNEL_OK")
</pallas_src>

<mosaic_0001>
module attributes {stable_mosaic.version = 11 : i64} {
  func.func @conv_bn_relu_kernel(%arg0: i32, %arg1: memref<1x4x432xbf16, #tpu.memory_space<vmem>>, %arg2: memref<9x8x4xbf16, #tpu.memory_space<vmem>>, %arg3: memref<8x1xf32, #tpu.memory_space<vmem>>, %arg4: memref<1x8x384xbf16, #tpu.memory_space<vmem>>) attributes {dimension_semantics = [#tpu.dimension_semantics<parallel>], iteration_bounds = array<i64: 2>, scalar_prefetch = 0 : i64, scratch_operands = 0 : i64, tpu.core_type = #tpu.core_type<tc>, window_params = [{transform_indices = @transform_0, window_bounds = array<i64: 1, 4, 432>}, {pipeline_mode = #tpu.pipeline_mode<synchronous>, transform_indices = @transform_1, window_bounds = array<i64: 9, 8, 4>}, {pipeline_mode = #tpu.pipeline_mode<synchronous>, transform_indices = @transform_2, window_bounds = array<i64: 8, 1>}, {transform_indices = @transform_3, window_bounds = array<i64: 1, 8, 384>}]} {
    %c0 = arith.constant 0 : index
    %c0_0 = arith.constant 0 : index
    %c0_1 = arith.constant 0 : index
    %0 = vector.load %arg1[%c0, %c0_0, %c0_1] : memref<1x4x432xbf16, #tpu.memory_space<vmem>>, vector<1x4x432xbf16>
    %1 = vector.shape_cast %0 : vector<1x4x432xbf16> to vector<4x432xbf16>
    %2 = vector.extract_strided_slice %1 {offsets = [0, 0], sizes = [4, 384], strides = [1, 1]} : vector<4x432xbf16> to vector<4x384xbf16>
    %c0_2 = arith.constant 0 : index
    %c0_3 = arith.constant 0 : index
    %c0_4 = arith.constant 0 : index
    %3 = vector.load %arg2[%c0_2, %c0_3, %c0_4] : memref<9x8x4xbf16, #tpu.memory_space<vmem>>, vector<1x8x4xbf16>
    %4 = vector.shape_cast %3 : vector<1x8x4xbf16> to vector<8x4xbf16>
    %cst = arith.constant dense<0.000000e+00> : vector<8x384xf32>
    %5 = tpu.matmul %4, %2, %cst {dimension_numbers = #tpu.dot_dimension_numbers<[1], [0], [0], [1], [0, 0, 1, 1], [], []>} : vector<8x4xbf16>, vector<4x384xbf16>, vector<8x384xf32> -> vector<8x384xf32>
    %6 = vector.extract_strided_slice %1 {offsets = [0, 1], sizes = [4, 384], strides = [1, 1]} : vector<4x432xbf16> to vector<4x384xbf16>
    %c1 = arith.constant 1 : index
    %c0_5 = arith.constant 0 : index
    %c0_6 = arith.constant 0 : index
    %7 = vector.load %arg2[%c1, %c0_5, %c0_6] : memref<9x8x4xbf16, #tpu.memory_space<vmem>>, vector<1x8x4xbf16>
    %8 = vector.shape_cast %7 : vector<1x8x4xbf16> to vector<8x4xbf16>
    %cst_7 = arith.constant dense<0.000000e+00> : vector<8x384xf32>
    %9 = tpu.matmul %8, %6, %cst_7 {dimension_numbers = #tpu.dot_dimension_numbers<[1], [0], [0], [1], [0, 0, 1, 1], [], []>} : vector<8x4xbf16>, vector<4x384xbf16>, vector<8x384xf32> -> vector<8x384xf32>
    %10 = arith.addf %5, %9 : vector<8x384xf32>
    %11 = vector.extract_strided_slice %1 {offsets = [0, 2], sizes = [4, 384], strides = [1, 1]} : vector<4x432xbf16> to vector<4x384xbf16>
    %c2 = arith.constant 2 : index
    %c0_8 = arith.constant 0 : index
    %c0_9 = arith.constant 0 : index
    %12 = vector.load %arg2[%c2, %c0_8, %c0_9] : memref<9x8x4xbf16, #tpu.memory_space<vmem>>, vector<1x8x4xbf16>
    %13 = vector.shape_cast %12 : vector<1x8x4xbf16> to vector<8x4xbf16>
    %cst_10 = arith.constant dense<0.000000e+00> : vector<8x384xf32>
    %14 = tpu.matmul %13, %11, %cst_10 {dimension_numbers = #tpu.dot_dimension_numbers<[1], [0], [0], [1], [0, 0, 1, 1], [], []>} : vector<8x4xbf16>, vector<4x384xbf16>, vector<8x384xf32> -> vector<8x384xf32>
    %15 = arith.addf %10, %14 : vector<8x384xf32>
    %16 = vector.extract_strided_slice %1 {offsets = [0, 18], sizes = [4, 384], strides = [1, 1]} : vector<4x432xbf16> to vector<4x384xbf16>
    %c3 = arith.constant 3 : index
    %c0_11 = arith.constant 0 : index
    %c0_12 = arith.constant 0 : index
    %17 = vector.load %arg2[%c3, %c0_11, %c0_12] : memref<9x8x4xbf16, #tpu.memory_space<vmem>>, vector<1x8x4xbf16>
    %18 = vector.shape_cast %17 : vector<1x8x4xbf16> to vector<8x4xbf16>
    %cst_13 = arith.constant dense<0.000000e+00> : vector<8x384xf32>
    %19 = tpu.matmul %18, %16, %cst_13 {dimension_numbers = #tpu.dot_dimension_numbers<[1], [0], [0], [1], [0, 0, 1, 1], [], []>} : vector<8x4xbf16>, vector<4x384xbf16>, vector<8x384xf32> -> vector<8x384xf32>
    %20 = arith.addf %15, %19 : vector<8x384xf32>
    %21 = vector.extract_strided_slice %1 {offsets = [0, 19], sizes = [4, 384], strides = [1, 1]} : vector<4x432xbf16> to vector<4x384xbf16>
    %c4 = arith.constant 4 : index
    %c0_14 = arith.constant 0 : index
    %c0_15 = arith.constant 0 : index
    %22 = vector.load %arg2[%c4, %c0_14, %c0_15] : memref<9x8x4xbf16, #tpu.memory_space<vmem>>, vector<1x8x4xbf16>
    %23 = vector.shape_cast %22 : vector<1x8x4xbf16> to vector<8x4xbf16>
    %cst_16 = arith.constant dense<0.000000e+00> : vector<8x384xf32>
    %24 = tpu.matmul %23, %21, %cst_16 {dimension_numbers = #tpu.dot_dimension_numbers<[1], [0], [0], [1], [0, 0, 1, 1], [], []>} : vector<8x4xbf16>, vector<4x384xbf16>, vector<8x384xf32> -> vector<8x384xf32>
    %25 = arith.addf %20, %24 : vector<8x384xf32>
    %26 = vector.extract_strided_slice %1 {offsets = [0, 20], sizes = [4, 384], strides = [1, 1]} : vector<4x432xbf16> to vector<4x384xbf16>
    %c5 = arith.constant 5 : index
    %c0_17 = arith.constant 0 : index
    %c0_18 = arith.constant 0 : index
    %27 = vector.load %arg2[%c5, %c0_17, %c0_18] : memref<9x8x4xbf16, #tpu.memory_space<vmem>>, vector<1x8x4xbf16>
    %28 = vector.shape_cast %27 : vector<1x8x4xbf16> to vector<8x4xbf16>
    %cst_19 = arith.constant dense<0.000000e+00> : vector<8x384xf32>
    %29 = tpu.matmul %28, %26, %cst_19 {dimension_numbers = #tpu.dot_dimension_numbers<[1], [0], [0], [1], [0, 0, 1, 1], [], []>} : vector<8x4xbf16>, vector<4x384xbf16>, vector<8x384xf32> -> vector<8x384xf32>
    %30 = arith.addf %25, %29 : vector<8x384xf32>
    %31 = vector.extract_strided_slice %1 {offsets = [0, 36], sizes = [4, 384], strides = [1, 1]} : vector<4x432xbf16> to vector<4x384xbf16>
    %c6 = arith.constant 6 : index
    %c0_20 = arith.constant 0 : index
    %c0_21 = arith.constant 0 : index
    %32 = vector.load %arg2[%c6, %c0_20, %c0_21] : memref<9x8x4xbf16, #tpu.memory_space<vmem>>, vector<1x8x4xbf16>
    %33 = vector.shape_cast %32 : vector<1x8x4xbf16> to vector<8x4xbf16>
    %cst_22 = arith.constant dense<0.000000e+00> : vector<8x384xf32>
    %34 = tpu.matmul %33, %31, %cst_22 {dimension_numbers = #tpu.dot_dimension_numbers<[1], [0], [0], [1], [0, 0, 1, 1], [], []>} : vector<8x4xbf16>, vector<4x384xbf16>, vector<8x384xf32> -> vector<8x384xf32>
    %35 = arith.addf %30, %34 : vector<8x384xf32>
    %36 = vector.extract_strided_slice %1 {offsets = [0, 37], sizes = [4, 384], strides = [1, 1]} : vector<4x432xbf16> to vector<4x384xbf16>
    %c7 = arith.constant 7 : index
    %c0_23 = arith.constant 0 : index
    %c0_24 = arith.constant 0 : index
    %37 = vector.load %arg2[%c7, %c0_23, %c0_24] : memref<9x8x4xbf16, #tpu.memory_space<vmem>>, vector<1x8x4xbf16>
    %38 = vector.shape_cast %37 : vector<1x8x4xbf16> to vector<8x4xbf16>
    %cst_25 = arith.constant dense<0.000000e+00> : vector<8x384xf32>
    %39 = tpu.matmul %38, %36, %cst_25 {dimension_numbers = #tpu.dot_dimension_numbers<[1], [0], [0], [1], [0, 0, 1, 1], [], []>} : vector<8x4xbf16>, vector<4x384xbf16>, vector<8x384xf32> -> vector<8x384xf32>
    %40 = arith.addf %35, %39 : vector<8x384xf32>
    %41 = vector.extract_strided_slice %1 {offsets = [0, 38], sizes = [4, 384], strides = [1, 1]} : vector<4x432xbf16> to vector<4x384xbf16>
    %c8 = arith.constant 8 : index
    %c0_26 = arith.constant 0 : index
    %c0_27 = arith.constant 0 : index
    %42 = vector.load %arg2[%c8, %c0_26, %c0_27] : memref<9x8x4xbf16, #tpu.memory_space<vmem>>, vector<1x8x4xbf16>
    %43 = vector.shape_cast %42 : vector<1x8x4xbf16> to vector<8x4xbf16>
    %cst_28 = arith.constant dense<0.000000e+00> : vector<8x384xf32>
    %44 = tpu.matmul %43, %41, %cst_28 {dimension_numbers = #tpu.dot_dimension_numbers<[1], [0], [0], [1], [0, 0, 1, 1], [], []>} : vector<8x4xbf16>, vector<4x384xbf16>, vector<8x384xf32> -> vector<8x384xf32>
    %45 = arith.addf %40, %44 : vector<8x384xf32>
    %c0_29 = arith.constant 0 : index
    %c0_30 = arith.constant 0 : index
    %46 = vector.load %arg3[%c0_29, %c0_30] : memref<8x1xf32, #tpu.memory_space<vmem>>, vector<8x1xf32>
    %47 = vector.broadcast %46 : vector<8x1xf32> to vector<8x384xf32>
    %48 = arith.addf %45, %47 : vector<8x384xf32>
    %cst_31 = arith.constant 0.000000e+00 : f32
    %49 = vector.broadcast %cst_31 : f32 to vector<8x384xf32>
    %50 = arith.maximumf %48, %49 : vector<8x384xf32>
    %51 = arith.truncf %50 : vector<8x384xf32> to vector<8x384xbf16>
    %c0_32 = arith.constant 0 : index
    %c0_33 = arith.constant 0 : index
    %c0_34 = arith.constant 0 : index
    %52 = vector.load %arg4[%c0_32, %c0_33, %c0_34] : memref<1x8x384xbf16, #tpu.memory_space<vmem>>, vector<1x8x384xbf16>
    %53 = vector.shape_cast %52 : vector<1x8x384xbf16> to vector<8x384xbf16>
    %54 = vector.shape_cast %51 : vector<8x384xbf16> to vector<1x8x384xbf16>
    tpu.vector_store %arg4[%c0_32, %c0_33, %c0_34], %54 {strides = array<i32>} : memref<1x8x384xbf16, #tpu.memory_space<vmem>>, vector<1x8x384xbf16>,
    return
  }
  func.func @transform_0(%arg0: i32) -> (i32, i32, i32) {
    %c0_i32 = arith.constant 0 : i32
    %c0_i32_0 = arith.constant 0 : i32
    %c0_i32_1 = arith.constant 0 : i32
    return %arg0, %c0_i32, %c0_i32_0 : i32, i32, i32
  }
  func.func @transform_1(%arg0: i32) -> (i32, i32, i32) {
    %c0_i32 = arith.constant 0 : i32
    %c0_i32_0 = arith.constant 0 : i32
    %c0_i32_1 = arith.constant 0 : i32
    %c0_i32_2 = arith.constant 0 : i32
    return %c0_i32, %c0_i32_0, %c0_i32_1 : i32, i32, i32
  }
  func.func @transform_2(%arg0: i32) -> (i32, i32) {
    %c0_i32 = arith.constant 0 : i32
    %c0_i32_0 = arith.constant 0 : i32
    %c0_i32_1 = arith.constant 0 : i32
    return %c0_i32, %c0_i32_0 : i32, i32
  }
  func.func @transform_3(%arg0: i32) -> (i32, i32, i32) {
    %c0_i32 = arith.constant 0 : i32
    %c0_i32_0 = arith.constant 0 : i32
    %c0_i32_1 = arith.constant 0 : i32
    return %arg0, %c0_i32, %c0_i32_0 : i32, i32, i32
  }
}

</mosaic_0001>

<bundles_post_ra>
// kernel: tpu_custom_call.1
= control target key start
LH: loop header
LB: loop body
LE: loop exit
PB: predicated region body
PF: predicated region fallthrough
CT: control target
= control target key end

     0   :  { %8 = vsyncpa [#allocation3], 0  ;;  %s1778_s0 = inlined_call_operand.vmem [shape: bf16[2,4,432], index: 0, kind: input, shape index: {}]   ;;  %s1779_s1 = inlined_call_operand.vmem [shape: bf16[9,8,4], index: 1, kind: input, shape index: {}]   ;;  %s1780_s2 = inlined_call_operand.vmem [shape: f32[8,1], index: 2, kind: input, shape index: {}]   ;;  %s1781_s3 = inlined_call_operand.hbm [shape: bf16[2,8,384], index: 3, kind: output, shape index: {}]  }
   0x1   :  { %10 = vsyncpa [#allocation3 + $0x1], 0  ;;  %s1536_s12 = smov 0   ;;  %s1538_s13 = smov 0  }
   0x2   :  { %s1540_s14 = smov 0   ;;  %s1542_s15 = smov 0  }
   0x3 LB: > { %s1557_s16 = sadd.s32 4294967295, %s1501_s15   ;;  %s1263_s17 = sadd.s32 4294967294, %s1501_s15   ;;  %s1501_s15 = sphi %s1542_s15, %s1787_s15   ;;  %s1497_s14 = sphi %s1540_s14, %s1786_s14   ;;  %s1493_s13 = sphi %s1538_s13, %s1785_s13   ;;  %s1489_s12 = sphi %s1536_s12, %s1784_s12  }
   0x4   : > { %s1561_s18 = sadd.s32 1, %s1501_s15   ;;  %s91_s19 = sadd.s32 1, %s1497_s14 }
   0x5   : > { %s88_s20 = ssub.s32 %s1501_s15, %s1561_s18  ;;  %p101_p0 = scmp.ne.s32.totalorder %s1497_s14, %s1493_s13 }
   0x6   : > { %p89_p1 = scmp.eq.s32.totalorder %s88_s20, 0  ;;  %p102_p2 = scmp.eq.s32.totalorder %s1557_s16, 1 }
   0x7   : > { %p107_p3 = scmp.ne.s32.totalorder %s1493_s13, %s1489_s12  ;;  %p108_p4 = scmp.eq.s32.totalorder %s1263_s17, 1 }
   0x8   : > { %s1572_s21 = scalar_select %p89_p1, %s1497_s14, %s91_s19  }
   0x9   : > { %p1574_p5 = por %p102_p2, %p101_p0  ;;  %p1578_p6 = por %p108_p4, %p107_p3 }
   0xa   : > { %p1266_p7 = scmp.ge.s32.totalorder %s1501_s15, 1  ;;  %p140_p8 = scmp.lt.s32.totalorder %s1501_s15, 3 }
   0xc   : > { %p141_p9 = pnand %p1266_p7, %p140_p8 }
   0xd   : > { %p164_p10 = scmp.lt.s32.totalorder (!%p141_p9), %s1557_s16, 1  ;;  %v179_v0 = vlaneseq (!%p141_p9)  ;;  %v1503_v1 = vmov (!%p141_p9), 1983009808   ;;  %v1504_v5 = vmov (!%p141_p9), 0.0   ;;  %v1505_v6 = vmov (!%p141_p9), 0   ;;  %s1507_s29 = smov (!%p141_p9), 127  }
   0xe   : > { %144 = sbr.rel (%p141_p9) target bundleno = 452 (0x1c4), region = 32  ;;  %v177_v2 = vunpack.c.l.s4 (!%p141_p9), %v1503_v1  ;;  %1330 = vmatprep.subr.bf16.mxu1 (!%p141_p9), %v1504_v5  ;;  %250 = vmatprep.mubr.bf16.mxu0 (!%p141_p9), %v1505_v6  ;;  %vm1506_vm0 = vmmov (!%p141_p9), 0   ;;  %s1508_s30 = smov (!%p141_p9), 126   ;;  %v1162_v14 = vld [vmem:[%s1780_s2] sm:$0xff] (!%p141_p9)  ;;  %vm200_vm1 = vcmask (!%p141_p9), 1039360   ;;  %vm208_vm2 = vcmask (!%p141_p9), 1041408  }
   0xf   : > { %v180_v3 = vshrl.u32 (!%p141_p9), %v179_v0, 7  ;;  %1437 = vset.pattern.permute.xlu0 (!%p141_p9), %v1505_v6  ;;  %1332 = vmatprep.mubr.msk.bf16.mxu1 (!%p141_p9), %vm1506_vm0, %v1504_v5  ;;  %s1509_s4 = smov (!%p141_p9), 110   ;;  %s1510_s5 = smov (!%p141_p9), 109   ;;  %v1269_v23 = vld [vmem:[%s1779_s1 + $0x4] sm:$0xf] (!%p141_p9)  ;;  %vm204_vm3 = vcmask (!%p141_p9), 31744  }
  0x10   : > { %v178_v4 = vunpack.c.0.s8 (!%p141_p9), %v177_v2  ;;  %s1511_s6 = smov (!%p141_p9), 108   ;;  %s1512_s7 = smov (!%p141_p9), 92   ;;  %vm402_vm4 = vcmask (!%p141_p9), 1031168   ;;  %v171_v34 = vld [vmem:[%s1779_s1] sm:$0xf] (!%p141_p9)  ;;  %vm512_vm5 = vcmask (!%p141_p9), 900096  }
  0x11   : > { %s1513_s8 = smov (!%p141_p9), 91   ;;  %s1514_s9 = smov (!%p141_p9), 90   ;;  %v1276_v44 = vld [vmem:[%s1779_s1 + $0x8] sm:$0xf] (!%p141_p9)  ;;  %vm622_vm6 = vcmask (!%p141_p9), 891904   ;;  %vm732_vm7 = vcmask (!%p141_p9), 883712  }
  0x12   : > { %v181_v7 = vsub.s32 (!%p141_p9), %v178_v4, %v180_v3  ;;  %v1280_v54 = vld [vmem:[%s1779_s1 + $0xc] sm:$0xf] (!%p141_p9)  ;;  %v1284_v0 = vld [vmem:[%s1779_s1 + $0x10] sm:$0xf] (!%p141_p9)  ;;  %vm842_vm8 = vcmask (!%p141_p9), 752640   ;;  %vm952_vm9 = vcmask (!%p141_p9), 744448  }
  0x13   : > { %vm1062_vm10 = vcmask (!%p141_p9), 736256   ;;  %s161_s17 = sand.u32 (!%p141_p9), 1, %s1493_s13   ;;  %s1385_s20 = smul.u32 (!%p141_p9), 192, %s1557_s16 }
  0x14   : > { %s1384_s19 = smul.u32 (!%p141_p9), 12, %s161_s17 }
  0x15   : > { %s165_s24 = scalar_select %p164_p10, %s1557_s16, 1 }
  0x16   : > { %s1190_s16 = scalar_lea.sflag [#allocation3], %s161_s17 }
  0x17   : > { %s1309_s25 = sshll.u32 %s165_s24, 3  ;;  %s163_s24 = scalar_lea.vmem [#allocation2], %s1384_s19 }
  0x18   : > { %s168_s28 = scalar_lea.vmem %s1778_s0, %s1309_s25  ;;  %s1204_s25 = sshll.u32 %s163_s24, 4  ;;  %s1736_s25 = int_to_ptr.vmem [resolvable:$true] %s1204_s25 }
  0x19   : > { %v170_v8 = vld [vmem:[%s168_s28] sm:$0xff]  ;;  %s1734_s28 = scalar_lea.hbm %s1781_s3, %s1385_s20 }
  0x1a   : > { %v1594_v9 = vrot.slane %v170_v8, %v181_v7  ;;  %v175_v10 = vcombine.high %v170_v8, %v170_v8 }
  0x1c   : > { %192 = vrot.lane.b32.xlu0 %v1594_v9, %s1507_s29  ;;  %v1597_v11 = vrot.slane %v175_v10, %v181_v7  ;;  %v190_v12 = vcombine.high %v1594_v9, %v1594_v9  ;;  %v303_v26 = vsel %vm208_vm2, %v1594_v9, 0 }
  0x1e   : > { %196 = vrot.lane.b32.xlu1 %v1597_v11, %s1507_s29  ;;  %v191_v13 = vcombine.high %v1597_v11, %v1597_v11  ;;  %v309_v27 = vsel %vm208_vm2, %v1597_v11, 0 }
  0x20   : > { %194 = vrot.lane.b32.xlu0 %v190_v12, %s1507_s29 }
  0x22   : > { %198 = vrot.lane.b32.xlu1 %v191_v13, %s1507_s29  ;;  %s1439_s29 = scalar_lea.vmem %s1736_s25, 192 }
  0x23   : > { %p1440_p11 = scmp.ne.s32.totalorder %s1736_s25, %s1439_s29 }
  0x24   : > { %394 = vrot.lane.b32.xlu0 %v1594_v9, %s1508_s30 }
  0x25   : > { %p1441_p12 = pnand %p1440_p11, %p1574_p5 }
  0x26   : > { %396 = vrot.lane.b32.xlu1 %v190_v12, %s1508_s30 }
  0x27   : > { %p1442_p13 = pneg %p1441_p12 }
  0x28   : > { %398 = vrot.lane.b32.xlu0 %v1597_v11, %s1508_s30 }
  0x2a   : > { %400 = vrot.lane.b32.xlu1 %v191_v13, %s1508_s30  ;;  %s1515_s30 = smov [#allocation2]  }
  0x2c   : > { %504 = vrot.lane.b32.xlu0 %v1594_v9, %s1509_s4 }
  0x2e   : > { %506 = vrot.lane.b32.xlu1 %v190_v12, %s1509_s4 }
  0x30   : > { %508 = vrot.lane.b32.xlu0 %v1597_v11, %s1509_s4 }
  0x32   : > { %510 = vrot.lane.b32.xlu1 %v191_v13, %s1509_s4  ;;  %s1443_s4 = sshll.u32 %s1515_s30, 4  ;;  %s1444_s4 = int_to_ptr.vmem [resolvable:$false] %s1443_s4 }
  0x33   : > { %p1446_p0 = scmp.lt.s32.totalorder %s1736_s25, %s1444_s4 }
  0x34   : > { %614 = vrot.lane.b32.xlu0 %v1594_v9, %s1510_s5 }
  0x36   : > { %616 = vrot.lane.b32.xlu1 %v190_v12, %s1510_s5 }
  0x38   : > { %618 = vrot.lane.b32.xlu0 %v1597_v11, %s1510_s5 }
  0x3a   : > { %620 = vrot.lane.b32.xlu1 %v191_v13, %s1510_s5  ;;  %s1445_s5 = scalar_lea.vmem %s1444_s4, 384 }
  0x3b   : > { %p1447_p1 = scmp.lt.s32.totalorder %s1445_s5, %s1439_s29 }
  0x3c   : > { %724 = vrot.lane.b32.xlu0 %v1594_v9, %s1511_s6 }
  0x3d   : > { %p1448_p2 = por %p1447_p1, %p1446_p0 }
  0x3e   : > { %726 = vrot.lane.b32.xlu1 %v190_v12, %s1511_s6 }
  0x3f   : > { %p1449_p3 = pnand %p1448_p2, %p1442_p13 }
  0x40   : > { %728 = vrot.lane.b32.xlu0 %v1597_v11, %s1511_s6 }
  0x42   : > { %730 = vrot.lane.b32.xlu1 %v191_v13, %s1511_s6 }
  0x44   : > { %834 = vrot.lane.b32.xlu0 %v1594_v9, %s1512_s7 }
  0x46   : > { %836 = vrot.lane.b32.xlu1 %v190_v12, %s1512_s7 }
  0x48   : > { %838 = vrot.lane.b32.xlu0 %v1597_v11, %s1512_s7 }
  0x4a   : > { %840 = vrot.lane.b32.xlu1 %v191_v13, %s1512_s7 }
  0x4c   : > { %944 = vrot.lane.b32.xlu0 %v1594_v9, %s1513_s8 }
  0x4e   : > { %946 = vrot.lane.b32.xlu1 %v190_v12, %s1513_s8 }
  0x50   : > { %948 = vrot.lane.b32.xlu0 %v1597_v11, %s1513_s8 }
  0x52   : > { %950 = vrot.lane.b32.xlu1 %v191_v13, %s1513_s8 }
  0x54   : > { %1054 = vrot.lane.b32.xlu0 %v1594_v9, %s1514_s9 }
  0x56   : > { %1056 = vrot.lane.b32.xlu1 %v190_v12, %s1514_s9 }
  0x58   : > { %1058 = vrot.lane.b32.xlu0 %v1597_v11, %s1514_s9 }
  0x5a   : > { %1060 = vrot.lane.b32.xlu1 %v191_v13, %s1514_s9 }
  0x5c   : > { %1165 = vperm.xlu0 %1437, %v1162_v14  }
  0x8e   : > { %v193_v15 = vpop.permute.xlu0 %192 }
  0x90   : > { %v197_v16 = vpop.permute.xlu1 %196 }
  0x92   : > { %v195_v17 = vpop.permute.xlu0 %194 }
  0x93   : > { %v202_v18 = vsel %vm200_vm1, %v195_v17, %v197_v16  ;;  %v201_v19 = vsel %vm200_vm1, %v193_v15, %v195_v17 }
  0x94   : > { %1270 = vmatprep.subr.msk.bf16.mxu0 %vm208_vm2, %v202_v18  ;;  %v199_v20 = vpop.permute.xlu1 %198  ;;  %v210_v21 = vsel %vm208_vm2, %v201_v19, 0 }
  0x95   : > { %219 = vmatpush1.bf16.msra.mxu0 %v210_v21  ;;  %v203_v22 = vsel %vm200_vm1, %v197_v16, %v199_v20 }
  0x96   : > { %v216_v24 = vsel %vm208_vm2, %v203_v22, 0  ;;  %v395_v25 = vpop.permute.xlu0 %394  ;;  %1273 = vmatprep.subr.msk.bf16.mxu0 %vm208_vm2, %v190_v12  ;;  %v1288_v12 = vld [vmem:[%s1779_s1 + $0x14] sm:$0xf]  ;;  %v1292_v22 = vld [vmem:[%s1779_s1 + $0x18] sm:$0xf] }
  0x97   : > { %1331 = vmatpush3.bf16.msra.mxu1 %v216_v24 }
  0x98   : > { %1271 = vmatmul.mubr.msk.bf16.vlgmr.msra.gmra.mrb[0].mxu0 %vm204_vm3, %v1269_v23  ;;  %1336 = vmatprep.subr.bf16.mxu1 %v1504_v5  ;;  %v397_v28 = vpop.permute.xlu1 %396 }
  0x99   : > { %312 = vmatpush1.bf16.msra.mxu0 %v303_v26  ;;  %343 = vmatprep.mubr.bf16.mxu0 %v1505_v6  ;;  %v403_v30 = vsel %vm402_vm4, %v395_v25, %v397_v28 }
  0x9a   : > { %1333 = vmatmul.mubr.msk.bf16.vlgmr.msra.gmra.mrb[0].mxu1 %vm204_vm3, %v1269_v23  ;;  %v399_v29 = vpop.permute.xlu0 %398  ;;  %v410_v35 = vsel %vm208_vm2, %v403_v30, 0 }
  0x9b   : > { %1337 = vmatpush3.bf16.msra.mxu1 %v309_v27  ;;  %v404_v31 = vsel %vm402_vm4, %v397_v28, %v399_v29  ;;  %1338 = vmatprep.mubr.msk.bf16.mxu1 %vm1506_vm0, %v1504_v5 }
  0x9c   : > { %1277 = vmatprep.subr.msk.bf16.mxu0 %vm208_vm2, %v404_v31  ;;  %v401_v32 = vpop.permute.xlu1 %400  ;;  %1342 = vmatprep.subr.bf16.mxu1 %v1504_v5 }
  0x9d   : > { %v405_v33 = vsel %vm402_vm4, %v399_v29, %v401_v32  ;;  %v1296_v32 = vld [vmem:[%s1779_s1 + $0x1c] sm:$0xf] }
  0x9e   : > { %v505_v36 = vpop.permute.xlu0 %504  ;;  %v416_v37 = vsel %vm208_vm2, %v405_v33, 0 }
  0xa0   : > { %1274 = vmatmul.mubr.msk.bf16.vlgmr.msra.gmra.mrb[4].mxu0 %vm204_vm3, %v171_v34  ;;  %v507_v38 = vpop.permute.xlu1 %506 }
  0xa1   : > { %419 = vmatpush1.bf16.msra.mxu0 %v410_v35  ;;  %450 = vmatprep.mubr.bf16.mxu0 %v1505_v6  ;;  %v513_v40 = vsel %vm512_vm5, %v505_v36, %v507_v38  ;;  %v1300_v35 = vld [vmem:[%s1779_s1 + $0x20] sm:$0xf] }
  0xa2   : > { %1339 = vmatmul.mubr.msk.bf16.vlgmr.msra.gmra.mrb[4].mxu1 %vm204_vm3, %v171_v34  ;;  %v509_v39 = vpop.permute.xlu0 %508  ;;  %v520_v45 = vsel %vm208_vm2, %v513_v40, 0 }
  0xa3   : > { %1343 = vmatpush3.bf16.msra.mxu1 %v416_v37  ;;  %v514_v41 = vsel %vm512_vm5, %v507_v38, %v509_v39  ;;  %1344 = vmatprep.mubr.msk.bf16.mxu1 %vm1506_vm0, %v1504_v5 }
  0xa4   : > { %1281 = vmatprep.subr.msk.bf16.mxu0 %vm208_vm2, %v514_v41  ;;  %v511_v42 = vpop.permute.xlu1 %510  ;;  %1348 = vmatprep.subr.bf16.mxu1 %v1504_v5 }
  0xa5   : > { %v515_v43 = vsel %vm512_vm5, %v509_v39, %v511_v42 }
  0xa6   : > { %v615_v46 = vpop.permute.xlu0 %614  ;;  %v526_v47 = vsel %vm208_vm2, %v515_v43, 0 }
  0xa8   : > { %1278 = vmatmul.mubr.msk.bf16.vlgmr.msra.gmra.mrb[8].mxu0 %vm204_vm3, %v1276_v44  ;;  %v617_v48 = vpop.permute.xlu1 %616 }
  0xa9   : > { %529 = vmatpush1.bf16.msra.mxu0 %v520_v45  ;;  %560 = vmatprep.mubr.bf16.mxu0 %v1505_v6  ;;  %v623_v50 = vsel %vm622_vm6, %v615_v46, %v617_v48 }
  0xaa   : > { %1345 = vmatmul.mubr.msk.bf16.vlgmr.msra.gmra.mrb[8].mxu1 %vm204_vm3, %v1276_v44  ;;  %v619_v49 = vpop.permute.xlu0 %618  ;;  %v630_v55 = vsel %vm208_vm2, %v623_v50, 0 }
  0xab   : > { %1349 = vmatpush3.bf16.msra.mxu1 %v526_v47  ;;  %v624_v51 = vsel %vm622_vm6, %v617_v48, %v619_v49  ;;  %1350 = vmatprep.mubr.msk.bf16.mxu1 %vm1506_vm0, %v1504_v5 }
  0xac   : > { %1285 = vmatprep.subr.msk.bf16.mxu0 %vm208_vm2, %v624_v51  ;;  %v621_v52 = vpop.permute.xlu1 %620  ;;  %1354 = vmatprep.subr.bf16.mxu1 %v1504_v5 }
  0xad   : > { %v625_v53 = vsel %vm622_vm6, %v619_v49, %v621_v52 }
  0xae   : > { %v725_v56 = vpop.permute.xlu0 %724  ;;  %v636_v57 = vsel %vm208_vm2, %v625_v53, 0 }
  0xb0   : > { %1282 = vmatmul.mubr.msk.bf16.vlgmr.msra.gmra.mrb[12].mxu0 %vm204_vm3, %v1280_v54  ;;  %v727_v58 = vpop.permute.xlu1 %726 }
  0xb1   : > { %639 = vmatpush1.bf16.msra.mxu0 %v630_v55  ;;  %670 = vmatprep.mubr.bf16.mxu0 %v1505_v6  ;;  %v733_v60 = vsel %vm732_vm7, %v725_v56, %v727_v58 }
  0xb2   : > { %1351 = vmatmul.mubr.msk.bf16.vlgmr.msra.gmra.mrb[12].mxu1 %vm204_vm3, %v1280_v54  ;;  %v729_v59 = vpop.permute.xlu0 %728  ;;  %v740_v1 = vsel %vm208_vm2, %v733_v60, 0 }
  0xb3   : > { %1355 = vmatpush3.bf16.msra.mxu1 %v636_v57  ;;  %v734_v61 = vsel %vm732_vm7, %v727_v58, %v729_v59  ;;  %1356 = vmatprep.mubr.msk.bf16.mxu1 %vm1506_vm0, %v1504_v5 }
  0xb4   : > { %1289 = vmatprep.subr.msk.bf16.mxu0 %vm208_vm2, %v734_v61  ;;  %v731_v62 = vpop.permute.xlu1 %730  ;;  %1360 = vmatprep.subr.bf16.mxu1 %v1504_v5 }
  0xb5   : > { %v735_v63 = vsel %vm732_vm7, %v729_v59, %v731_v62 }
  0xb6   : > { %v835_v2 = vpop.permute.xlu0 %834  ;;  %v746_v3 = vsel %vm208_vm2, %v735_v63, 0 }
  0xb8   : > { %1286 = vmatmul.mubr.msk.bf16.vlgmr.msra.gmra.mrb[16].mxu0 %vm204_vm3, %v1284_v0  ;;  %v837_v4 = vpop.permute.xlu1 %836 }
  0xb9   : > { %749 = vmatpush1.bf16.msra.mxu0 %v740_v1  ;;  %780 = vmatprep.mubr.bf16.mxu0 %v1505_v6  ;;  %v843_v8 = vsel %vm842_vm8, %v835_v2, %v837_v4 }
  0xba   : > { %1357 = vmatmul.mubr.msk.bf16.vlgmr.msra.gmra.mrb[16].mxu1 %vm204_vm3, %v1284_v0  ;;  %v839_v7 = vpop.permute.xlu0 %838  ;;  %v850_v13 = vsel %vm208_vm2, %v843_v8, 0 }
  0xbb   : > { %1361 = vmatpush3.bf16.msra.mxu1 %v746_v3  ;;  %v844_v9 = vsel %vm842_vm8, %v837_v4, %v839_v7  ;;  %1362 = vmatprep.mubr.msk.bf16.mxu1 %vm1506_vm0, %v1504_v5 }
  0xbc   : > { %1293 = vmatprep.subr.msk.bf16.mxu0 %vm208_vm2, %v844_v9  ;;  %v841_v10 = vpop.permute.xlu1 %840  ;;  %1366 = vmatprep.subr.bf16.mxu1 %v1504_v5 }
  0xbd   : > { %v845_v11 = vsel %vm842_vm8, %v839_v7, %v841_v10 }
  0xbe   : > { %v945_v14 = vpop.permute.xlu0 %944  ;;  %v856_v15 = vsel %vm208_vm2, %v845_v11, 0 }
  0xc0   : > { %1290 = vmatmul.mubr.msk.bf16.vlgmr.msra.gmra.mrb[20].mxu0 %vm204_vm3, %v1288_v12  ;;  %v947_v16 = vpop.permute.xlu1 %946 }
  0xc1   : > { %859 = vmatpush1.bf16.msra.mxu0 %v850_v13  ;;  %890 = vmatprep.mubr.bf16.mxu0 %v1505_v6  ;;  %v953_v18 = vsel %vm952_vm9, %v945_v14, %v947_v16 }
  0xc2   : > { %1363 = vmatmul.mubr.msk.bf16.vlgmr.msra.gmra.mrb[20].mxu1 %vm204_vm3, %v1288_v12  ;;  %v949_v17 = vpop.permute.xlu0 %948  ;;  %v960_v23 = vsel %vm208_vm2, %v953_v18, 0 }
  0xc3   : > { %1367 = vmatpush3.bf16.msra.mxu1 %v856_v15  ;;  %v954_v19 = vsel %vm952_vm9, %v947_v16, %v949_v17  ;;  %1368 = vmatprep.mubr.msk.bf16.mxu1 %vm1506_vm0, %v1504_v5 }
  0xc4   : > { %1297 = vmatprep.subr.msk.bf16.mxu0 %vm208_vm2, %v954_v19  ;;  %v951_v20 = vpop.permute.xlu1 %950  ;;  %1372 = vmatprep.subr.bf16.mxu1 %v1504_v5 }
  0xc5   : > { %v955_v21 = vsel %vm952_vm9, %v949_v17, %v951_v20 }
  0xc6   : > { %v1055_v24 = vpop.permute.xlu0 %1054  ;;  %v966_v25 = vsel %vm208_vm2, %v955_v21, 0 }
  0xc8   : > { %1294 = vmatmul.mubr.msk.bf16.vlgmr.msra.gmra.mrb[24].mxu0 %vm204_vm3, %v1292_v22  ;;  %v1057_v26 = vpop.permute.xlu1 %1056 }
  0xc9   : > { %969 = vmatpush1.bf16.msra.mxu0 %v960_v23  ;;  %1000 = vmatprep.mubr.bf16.mxu0 %v1505_v6  ;;  %v1063_v28 = vsel %vm1062_vm10, %v1055_v24, %v1057_v26 }
  0xca   : > { %1369 = vmatmul.mubr.msk.bf16.vlgmr.msra.gmra.mrb[24].mxu1 %vm204_vm3, %v1292_v22  ;;  %v1059_v27 = vpop.permute.xlu0 %1058  ;;  %v1070_v33 = vsel %vm208_vm2, %v1063_v28, 0 }
  0xcb   : > { %1373 = vmatpush3.bf16.msra.mxu1 %v966_v25  ;;  %v1064_v29 = vsel %vm1062_vm10, %v1057_v26, %v1059_v27  ;;  %1374 = vmatprep.mubr.msk.bf16.mxu1 %vm1506_vm0, %v1504_v5 }
  0xcc   : > { %1301 = vmatprep.subr.msk.bf16.mxu0 %vm208_vm2, %v1064_v29  ;;  %v1061_v30 = vpop.permute.xlu1 %1060  ;;  %1378 = vmatprep.subr.bf16.mxu1 %v1504_v5 }
  0xcd   : > { %v1065_v31 = vsel %vm1062_vm10, %v1059_v27, %v1061_v30 }
  0xce   : > { %v1076_v34 = vsel %vm208_vm2, %v1065_v31, 0 }
  0xd0   : > { %1298 = vmatmul.mubr.msk.bf16.vlgmr.msra.gmra.mrb[28].mxu0 %vm204_vm3, %v1296_v32 }
  0xd1   : > { %1079 = vmatpush1.bf16.msra.mxu0 %v1070_v33  ;;  %1110 = vmatprep.mubr.bf16.mxu0 %v1505_v6 }
  0xd2   : > { %1375 = vmatmul.mubr.msk.bf16.vlgmr.msra.gmra.mrb[28].mxu1 %vm204_vm3, %v1296_v32 }
  0xd3   : > { %1379 = vmatpush3.bf16.msra.mxu1 %v1076_v34  ;;  %1380 = vmatprep.mubr.msk.bf16.mxu1 %vm1506_vm0, %v1504_v5 }
  0xd8   : > { %1302 = vmatmul.mubr.msk.bf16.vlgmr.msra.gmra.mrb[32].mxu0 %vm204_vm3, %v1300_v35 }
  0xda   : > { %1381 = vmatmul.mubr.msk.bf16.vlgmr.msra.gmra.mrb[32].mxu1 %vm204_vm3, %v1300_v35 }
 0x16b   : > { %v252_v36 = vpop.f32.mrb[0].mxu0 }
 0x16c   : > { %v254_v37 = vpop.f32.mrb[1].mxu0 }
 0x16d   : > { %v256_v38 = vpop.f32.mrb[2].mxu0  ;;  %v293_v39 = vpop.f32.mrb[0].mxu1 }
 0x16e   : > { %v257_v40 = vpop.f32.mrb[3].mxu0  ;;  %v1334_v6 = vpop.f32.mrb[1].mxu1 }
 0x16f   : > { %v296_v41 = vpop.f32.mrb[2].mxu1 }
 0x170   : > { %v1335_v42 = vpop.f32.mrb[3].mxu1 }
 0x173   : > { %v345_v43 = vpop.f32.mrb[4].mxu0 }
 0x174   : > { %v346_v44 = vadd.f32 %v345_v43, %v252_v36  ;;  %v347_v45 = vpop.f32.mrb[5].mxu0 }
 0x175   : > { %v348_v5 = vadd.f32 %v347_v45, %v254_v37  ;;  %v349_v46 = vpop.f32.mrb[6].mxu0  ;;  %v386_v47 = vpop.f32.mrb[4].mxu1 }
 0x176   : > { %v387_v48 = vadd.f32 %v386_v47, %v293_v39  ;;  %v350_v49 = vpop.f32.mrb[7].mxu0  ;;  %v1340_v50 = vpop.f32.mrb[5].mxu1 }
 0x177   : > { %v389_v51 = vpop.f32.mrb[6].mxu1 }
 0x178   : > { %v1341_v52 = vpop.f32.mrb[7].mxu1 }
 0x17b   : > { %v452_v53 = vpop.f32.mrb[8].mxu0 }
 0x17c   : > { %v499_v54 = vadd.f32 %v452_v53, %v346_v44  ;;  %v454_v55 = vpop.f32.mrb[9].mxu0 }
 0x17d   : > { %v500_v56 = vadd.f32 %v454_v55, %v348_v5  ;;  %v456_v57 = vpop.f32.mrb[10].mxu0  ;;  %v493_v58 = vpop.f32.mrb[8].mxu1 }
 0x17e   : > { %v501_v59 = vadd.f32 %v493_v58, %v387_v48  ;;  %v457_v60 = vpop.f32.mrb[11].mxu0  ;;  %v1346_v61 = vpop.f32.mrb[9].mxu1 }
 0x17f   : > { %v496_v62 = vpop.f32.mrb[10].mxu1 }
 0x180   : > { %v1347_v63 = vpop.f32.mrb[11].mxu1 }
 0x183   : > { %v562_v0 = vpop.f32.mrb[12].mxu0 }
 0x184   : > { %v609_v1 = vadd.f32 %v562_v0, %v499_v54  ;;  %v564_v2 = vpop.f32.mrb[13].mxu0 }
 0x185   : > { %v610_v3 = vadd.f32 %v564_v2, %v500_v56  ;;  %v566_v4 = vpop.f32.mrb[14].mxu0  ;;  %v603_v7 = vpop.f32.mrb[12].mxu1 }
 0x186   : > { %v611_v8 = vadd.f32 %v603_v7, %v501_v59  ;;  %v567_v9 = vpop.f32.mrb[15].mxu0  ;;  %v1352_v10 = vpop.f32.mrb[13].mxu1 }
 0x187   : > { %v606_v11 = vpop.f32.mrb[14].mxu1  ;;  %v1166_v56 = vpop.permute.xlu0 %1165 }
 0x188   : > { %v1353_v12 = vpop.f32.mrb[15].mxu1 }
 0x18b   : > { %v672_v13 = vpop.f32.mrb[16].mxu0 }
 0x18c   : > { %v719_v14 = vadd.f32 %v672_v13, %v609_v1  ;;  %v674_v15 = vpop.f32.mrb[17].mxu0 }
 0x18d   : > { %v720_v16 = vadd.f32 %v674_v15, %v610_v3  ;;  %v676_v17 = vpop.f32.mrb[18].mxu0  ;;  %v713_v18 = vpop.f32.mrb[16].mxu1 }
 0x18e   : > { %v721_v19 = vadd.f32 %v713_v18, %v611_v8  ;;  %v677_v20 = vpop.f32.mrb[19].mxu0  ;;  %v1358_v21 = vpop.f32.mrb[17].mxu1 }
 0x18f   : > { %v716_v22 = vpop.f32.mrb[18].mxu1 }
 0x190   : > { %v1359_v23 = vpop.f32.mrb[19].mxu1 }
 0x193   : > { %v782_v24 = vpop.f32.mrb[20].mxu0 }
 0x194   : > { %v829_v25 = vadd.f32 %v782_v24, %v719_v14  ;;  %v784_v26 = vpop.f32.mrb[21].mxu0 }
 0x195   : > { %v830_v27 = vadd.f32 %v784_v26, %v720_v16  ;;  %v786_v28 = vpop.f32.mrb[22].mxu0  ;;  %v823_v29 = vpop.f32.mrb[20].mxu1 }
 0x196   : > { %v831_v30 = vadd.f32 %v823_v29, %v721_v19  ;;  %v787_v31 = vpop.f32.mrb[23].mxu0  ;;  %v1364_v32 = vpop.f32.mrb[21].mxu1 }
 0x197   : > { %v826_v33 = vpop.f32.mrb[22].mxu1 }
 0x198   : > { %v1365_v34 = vpop.f32.mrb[23].mxu1 }
 0x19b   : > { %v892_v35 = vpop.f32.mrb[24].mxu0 }
 0x19c   : > { %v939_v36 = vadd.f32 %v892_v35, %v829_v25  ;;  %v894_v37 = vpop.f32.mrb[25].mxu0 }
 0x19d   : > { %v940_v38 = vadd.f32 %v894_v37, %v830_v27  ;;  %v896_v39 = vpop.f32.mrb[26].mxu0  ;;  %v933_v40 = vpop.f32.mrb[24].mxu1 }
 0x19e   : > { %v941_v6 = vadd.f32 %v933_v40, %v831_v30  ;;  %v897_v41 = vpop.f32.mrb[27].mxu0  ;;  %v1370_v42 = vpop.f32.mrb[25].mxu1 }
 0x19f   : > { %v936_v43 = vpop.f32.mrb[26].mxu1 }
 0x1a0   : > { %v1371_v44 = vpop.f32.mrb[27].mxu1 }
 0x1a3   : > { %v1002_v45 = vpop.f32.mrb[28].mxu0 }
 0x1a4   : > { %v1049_v5 = vadd.f32 %v1002_v45, %v939_v36  ;;  %v1004_v46 = vpop.f32.mrb[29].mxu0 }
 0x1a5   : > { %v1050_v47 = vadd.f32 %v1004_v46, %v940_v38  ;;  %v1006_v48 = vpop.f32.mrb[30].mxu0  ;;  %v1043_v49 = vpop.f32.mrb[28].mxu1 }
 0x1a6   : > { %v1051_v50 = vadd.f32 %v1043_v49, %v941_v6  ;;  %v1007_v51 = vpop.f32.mrb[31].mxu0  ;;  %v1376_v52 = vpop.f32.mrb[29].mxu1 }
 0x1a7   : > { %v1046_v53 = vpop.f32.mrb[30].mxu1 }
 0x1a8   : > { %v1377_v54 = vpop.f32.mrb[31].mxu1 }
 0x1ab   : > { %v1112_v55 = vpop.f32.mrb[32].mxu0 }
 0x1ac   : > { %v1159_v57 = vadd.f32 %v1112_v55, %v1049_v5  ;;  %v1114_v58 = vpop.f32.mrb[33].mxu0 }
 0x1ad   : > { %v1160_v59 = vadd.f32 %v1114_v58, %v1050_v47  ;;  %v1116_v60 = vpop.f32.mrb[34].mxu0  ;;  %v1153_v61 = vpop.f32.mrb[32].mxu1 }
 0x1ae   : > { %v1168_v62 = vadd.f32 %v1166_v56, %v1159_v57  ;;  %v1161_v63 = vadd.f32 %v1153_v61, %v1051_v50  ;;  %v1117_v0 = vpop.f32.mrb[35].mxu0  ;;  %v1382_v1 = vpop.f32.mrb[33].mxu1 }
 0x1af   : > { %v1169_v2 = vadd.f32 %v1166_v56, %v1160_v59  ;;  %v1156_v3 = vpop.f32.mrb[34].mxu1 }
 0x1b0   : > { %v1171_v4 = vmax.f32 %v1168_v62, 0.0  ;;  %v1170_v7 = vadd.f32 %v1166_v56, %v1161_v63  ;;  %v1383_v8 = vpop.f32.mrb[35].mxu1 }
 0x1b1   : > { %v1172_v9 = vmax.f32 %v1169_v2, 0.0 }
 0x1b2   : > { %v1173_v10 = vmax.f32 %v1170_v7, 0.0 }
 0x1b3   : > { %v1310_v11 = vpack.c.bf16 %v1172_v9, %v1171_v4 }
 0x1b4   : > { %v1311_v12 = vpack.c.bf16 %v1173_v10, %v1173_v10 }
 0x1b5   : > { %1187 = vst [vmem:[%s163_s24] sm:$0xff] %v1310_v11 }
 0x1b6   : > { %1188 = vst [vmem:[%s163_s24 + $0x8] sm:$0xf] %v1311_v12 }
 0x1b7   : > { %1452 = shalt.err (!%p1449_p3)
}
 0x1b8   : > { %s1453_s6 = scalar_lea.hbm %s1734_s28, 192  ;;  %s1457_s9 = scalar_lea.hbm %s1781_s3, 384 }
 0x1b9   : > { %p1454_p4 = scmp.ne.s32.totalorder %s1734_s28, %s1453_s6  ;;  %p1458_p9 = scmp.lt.u32.totalorder %s1734_s28, %s1781_s3 }
 0x1ba   : > { %p1459_p10 = scmp.lt.u32.totalorder %s1457_s9, %s1453_s6  ;;  %p1461_p12 = scmp.lt.u32.totalorder %s1453_s6, %s1734_s28 }
 0x1bb   : > { %p1455_p7 = pnand %p1454_p4, %p1574_p5 }
 0x1bc   : > { %p1460_p11 = por %p1459_p10, %p1458_p9 }
 0x1bd   : > { %p1456_p8 = pneg %p1455_p7 }
 0x1be   : > { %p1462_p13 = por %p1461_p12, %p1460_p11 }
 0x1c0   : > { %p1463_p0 = pnand %p1462_p13, %p1456_p8 }
 0x1c2   : > { %1466 = shalt.err (!%p1463_p0)
}
 0x1c3   : > { %1386 = dma.vmem_to_hbm [thread:$0]  (%p1574_p5), %s1736_s25, 192, %s1734_s28, %s1190_s16  }
 0x1c4 PF: > { %p1392_p1 = scmp.ge.s32.totalorder %s1501_s15, 2  ;;  %s1216_s17 = sand.u32 1, %s1489_s12  }
 0x1c5   : > { %s1217_s19 = scalar_lea.sflag [#allocation3], %s1216_s17 }
 0x1c6   : > { %p1389_p2 = pnand %p1392_p1, %p1578_p6 }
 0x1c8   : > { %1484 = dma.done.wait (!%p1389_p2), %s1217_s19, 192  }
 0x1c9   : > { %1486 = vsyncadd (!%p1389_p2), %s1217_s19, 4294967104  ;;  %p13_p3 = scmp.ge.s32.totalorder %s1561_s18, 4   ;;  %s1784_s12 = smov %s1493_s13 }
 0x1ca   : > { %s1785_s13 = smov %s1497_s14  ;;  %s1786_s14 = smov %s1572_s21 }
 0x1cb   : > { %s1787_s15 = smov %s1561_s18  ;;  %15 = sbr.rel (!%p13_p3) target bundleno = 3 (0x3), region = 75 }
 0x1d2   :  { %1222 = vsyncpa [#allocation3], 1 }
 0x1d3   :  { %1224 = vsyncpa [#allocation3 + $0x1], 1 }

</bundles_post_ra>
